<compile_context>
chip_gen: v7x
topology: tpu7x:2x2x1
jax: 0.10.0
libtpu: 0.0.40
codegen_flags: <defaults>
</compile_context>

<pallas_src>
import jax
import jax.numpy as jnp
from jax.experimental import pallas as pl
from jax.experimental.pallas import tpu as pltpu


def _sobelxy_kernel(x_ref, o_ref):
    # x_ref / o_ref: (TB, 1, H, W) float32 blocks.
    x = x_ref[...]
    tb, c, H, W = x.shape

    # ---- lane (W) direction: zero-padded +/-1 shifts ----------------------
    zcol = jnp.zeros((tb, c, H, 1), x.dtype)
    xl = jnp.concatenate([zcol, x[..., :W - 1]], axis=3)   # x[.., j-1], 0 at j=0
    xr = jnp.concatenate([x[..., 1:], zcol], axis=3)       # x[.., j+1], 0 at j=W-1

    # Separable Sobel: horizontal difference / horizontal smoothing.
    a = xr - xl                     # -> sobel-x after vertical [1,2,1]
    b = xl + 2.0 * x + xr           # -> sobel-y after vertical [1,0,-1]

    # ---- sublane (H) direction: zero-padded +/-1 shifts -------------------
    zrow = jnp.zeros((tb, c, 1, W), x.dtype)
    a_up = jnp.concatenate([zrow, a[..., :H - 1, :]], axis=2)   # a[.., i-1, :]
    a_dn = jnp.concatenate([a[..., 1:, :], zrow], axis=2)       # a[.., i+1, :]
    b_up = jnp.concatenate([zrow, b[..., :H - 1, :]], axis=2)
    b_dn = jnp.concatenate([b[..., 1:, :], zrow], axis=2)

    sx = a_up + 2.0 * a + a_dn      # conv2d(x, [[-1,0,1],[-2,0,2],[-1,0,1]], pad=1)
    sy = b_up - b_dn                # conv2d(x, [[ 1,2,1],[ 0,0,0],[-1,-2,-1]], pad=1)

    # Single fused store (keeps the vector-store slot from binding on v5e).
    o_ref[...] = jnp.abs(sx) + jnp.abs(sy)


def _pick_batch_tile(N, H, W, itemsize=4, vmem_budget_bytes=16 * 1024 * 1024):
    """Largest batch tile that divides N, fits a conservative VMEM budget
    (double-buffered in+out blocks + temporaries ~ 8x block bytes; safe for
    v7x's 64 MiB VMEM) and, when possible, leaves >=2 grid steps so both
    TensorCores are used on v7x."""
    per_image_bytes = H * W * itemsize
    cap = max(1, vmem_budget_bytes // (8 * per_image_bytes))
    divisors = [d for d in range(1, N + 1) if N % d == 0 and d <= cap]
    preferred = [d for d in divisors if N // d >= 2] or divisors
    return max(preferred)


def sobelxy(x):
    """x: (N, 1, H, W) -> (N, 1, H, W) float32, |sobel_x(x)| + |sobel_y(x)| (padding=1)."""
    N, C, H, W = x.shape
    assert C == 1, "Sobelxy's conv weight is (1,1,3,3); input must have 1 channel"
    if x.dtype != jnp.float32:
        x = x.astype(jnp.float32)

    tb = _pick_batch_tile(N, H, W)
    grid = (N // tb,)

    return pl.pallas_call(
        _sobelxy_kernel,
        out_shape=jax.ShapeDtypeStruct((N, 1, H, W), jnp.float32),
        grid=grid,
        in_specs=[pl.BlockSpec((tb, 1, H, W), lambda n: (n, 0, 0, 0))],
        out_specs=pl.BlockSpec((tb, 1, H, W), lambda n: (n, 0, 0, 0)),
        compiler_params=pltpu.CompilerParams(
            dimension_semantics=("parallel",)),
    )(x)


def _sobelxy_ref(x):
    """Pure-JAX reference (lax.conv_general_dilated) for correctness check."""
    kx = jnp.array([[-1., 0., 1.], [-2., 0., 2.], [-1., 0., 1.]], jnp.float32)
    ky = jnp.array([[1., 2., 1.], [0., 0., 0.], [-1., -2., -1.]], jnp.float32)
    wx = kx[None, None]  # (O=1, I=1, 3, 3)
    wy = ky[None, None]
    dn = jax.lax.conv_dimension_numbers(x.shape, wx.shape, ("NCHW", "OIHW", "NCHW"))
    sx = jax.lax.conv_general_dilated(x, wx, (1, 1), ((1, 1), (1, 1)), dimension_numbers=dn)
    sy = jax.lax.conv_general_dilated(x, wy, (1, 1), ((1, 1), (1, 1)), dimension_numbers=dn)
    return jnp.abs(sx) + jnp.abs(sy)


if __name__ == "__main__":
    key = jax.random.PRNGKey(0)
    N, C, H, W = 4, 1, 16, 16
    x = jax.random.normal(key, (N, C, H, W), dtype=jnp.float32)

    out = jax.block_until_ready(sobelxy(x))
    ref = jax.block_until_ready(_sobelxy_ref(x))

    assert out.shape == (N, C, H, W), out.shape
    assert jnp.allclose(out, ref, atol=1e-4, rtol=1e-4), float(jnp.max(jnp.abs(out - ref)))
    print("KERNEL_OK")
</pallas_src>

<mosaic_0001>
module attributes {stable_mosaic.version = 11 : i64} {
  func.func @_sobelxy_kernel(%arg0: i32, %arg1: memref<2x1x16x16xf32, #tpu.memory_space<vmem>>, %arg2: memref<2x1x16x16xf32, #tpu.memory_space<vmem>>) attributes {dimension_semantics = [#tpu.dimension_semantics<parallel>], iteration_bounds = array<i64: 2>, scalar_prefetch = 0 : i64, scratch_operands = 0 : i64, tpu.core_type = #tpu.core_type<tc>, window_params = [{transform_indices = @transform_0, window_bounds = array<i64: 2, 1, 16, 16>}, {transform_indices = @transform_1, window_bounds = array<i64: 2, 1, 16, 16>}]} {
    %c0 = arith.constant 0 : index
    %c0_0 = arith.constant 0 : index
    %c0_1 = arith.constant 0 : index
    %c0_2 = arith.constant 0 : index
    %0 = vector.load %arg1[%c0, %c0_0, %c0_1, %c0_2] : memref<2x1x16x16xf32, #tpu.memory_space<vmem>>, vector<2x1x16x16xf32>
    %cst = arith.constant 0.000000e+00 : f32
    %1 = vector.broadcast %cst : f32 to vector<2x1x16x1xf32>
    %2 = vector.extract_strided_slice %0 {offsets = [0, 0, 0, 0], sizes = [2, 1, 16, 15], strides = [1, 1, 1, 1]} : vector<2x1x16x16xf32> to vector<2x1x16x15xf32>
    %3 = tpu.concatenate %1, %2 in 3 : vector<2x1x16x1xf32>, vector<2x1x16x15xf32> -> vector<2x1x16x16xf32>
    %4 = vector.extract_strided_slice %0 {offsets = [0, 0, 0, 1], sizes = [2, 1, 16, 15], strides = [1, 1, 1, 1]} : vector<2x1x16x16xf32> to vector<2x1x16x15xf32>
    %5 = tpu.concatenate %4, %1 in 3 : vector<2x1x16x15xf32>, vector<2x1x16x1xf32> -> vector<2x1x16x16xf32>
    %6 = arith.subf %5, %3 : vector<2x1x16x16xf32>
    %cst_3 = arith.constant 2.000000e+00 : f32
    %7 = vector.broadcast %cst_3 : f32 to vector<2x1x16x16xf32>
    %8 = arith.mulf %7, %0 : vector<2x1x16x16xf32>
    %9 = arith.addf %3, %8 : vector<2x1x16x16xf32>
    %10 = arith.addf %9, %5 : vector<2x1x16x16xf32>
    %cst_4 = arith.constant 0.000000e+00 : f32
    %11 = vector.broadcast %cst_4 : f32 to vector<2x1x1x16xf32>
    %12 = vector.extract_strided_slice %6 {offsets = [0, 0, 0, 0], sizes = [2, 1, 15, 16], strides = [1, 1, 1, 1]} : vector<2x1x16x16xf32> to vector<2x1x15x16xf32>
    %13 = tpu.concatenate %11, %12 in 2 : vector<2x1x1x16xf32>, vector<2x1x15x16xf32> -> vector<2x1x16x16xf32>
    %14 = vector.extract_strided_slice %6 {offsets = [0, 0, 1, 0], sizes = [2, 1, 15, 16], strides = [1, 1, 1, 1]} : vector<2x1x16x16xf32> to vector<2x1x15x16xf32>
    %15 = tpu.concatenate %14, %11 in 2 : vector<2x1x15x16xf32>, vector<2x1x1x16xf32> -> vector<2x1x16x16xf32>
    %16 = vector.extract_strided_slice %10 {offsets = [0, 0, 0, 0], sizes = [2, 1, 15, 16], strides = [1, 1, 1, 1]} : vector<2x1x16x16xf32> to vector<2x1x15x16xf32>
    %17 = tpu.concatenate %11, %16 in 2 : vector<2x1x1x16xf32>, vector<2x1x15x16xf32> -> vector<2x1x16x16xf32>
    %18 = vector.extract_strided_slice %10 {offsets = [0, 0, 1, 0], sizes = [2, 1, 15, 16], strides = [1, 1, 1, 1]} : vector<2x1x16x16xf32> to vector<2x1x15x16xf32>
    %19 = tpu.concatenate %18, %11 in 2 : vector<2x1x15x16xf32>, vector<2x1x1x16xf32> -> vector<2x1x16x16xf32>
    %cst_5 = arith.constant 2.000000e+00 : f32
    %20 = vector.broadcast %cst_5 : f32 to vector<2x1x16x16xf32>
    %21 = arith.mulf %20, %6 : vector<2x1x16x16xf32>
    %22 = arith.addf %13, %21 : vector<2x1x16x16xf32>
    %23 = arith.addf %22, %15 : vector<2x1x16x16xf32>
    %24 = arith.subf %17, %19 : vector<2x1x16x16xf32>
    %25 = math.absf %23 : vector<2x1x16x16xf32>
    %26 = math.absf %24 : vector<2x1x16x16xf32>
    %27 = arith.addf %25, %26 : vector<2x1x16x16xf32>
    %c0_6 = arith.constant 0 : index
    %c0_7 = arith.constant 0 : index
    %c0_8 = arith.constant 0 : index
    %c0_9 = arith.constant 0 : index
    %28 = vector.load %arg2[%c0_6, %c0_7, %c0_8, %c0_9] : memref<2x1x16x16xf32, #tpu.memory_space<vmem>>, vector<2x1x16x16xf32>
    tpu.vector_store %arg2[%c0_6, %c0_7, %c0_8, %c0_9], %27 {strides = array<i32>} : memref<2x1x16x16xf32, #tpu.memory_space<vmem>>, vector<2x1x16x16xf32>,
    return
  }
  func.func @transform_0(%arg0: i32) -> (i32, i32, i32, i32) {
    %c0_i32 = arith.constant 0 : i32
    %c0_i32_0 = arith.constant 0 : i32
    %c0_i32_1 = arith.constant 0 : i32
    %c0_i32_2 = arith.constant 0 : i32
    return %arg0, %c0_i32, %c0_i32_0, %c0_i32_1 : i32, i32, i32, i32
  }
  func.func @transform_1(%arg0: i32) -> (i32, i32, i32, i32) {
    %c0_i32 = arith.constant 0 : i32
    %c0_i32_0 = arith.constant 0 : i32
    %c0_i32_1 = arith.constant 0 : i32
    %c0_i32_2 = arith.constant 0 : i32
    return %arg0, %c0_i32, %c0_i32_0, %c0_i32_1 : i32, i32, i32, i32
  }
}

</mosaic_0001>

<bundles_post_ra>
// kernel: tpu_custom_call.1
= control target key start
LH: loop header
LB: loop body
LE: loop exit
PB: predicated region body
PF: predicated region fallthrough
CT: control target
= control target key end

     0   :  { %6 = vsyncpa [#allocation3], 0  ;;  %s753_s0 = inlined_call_operand.hbm [shape: f32[4,1,16,16], index: 0, kind: input, shape index: {}]   ;;  %s754_s1 = inlined_call_operand.hbm [shape: f32[4,1,16,16], index: 1, kind: output, shape index: {}]  }
   0x1   :  { %8 = vsyncpa [#allocation3 + $0x1], 0 }
   0x2   :  { %9 = vsyncpa [#allocation4], 0 }
   0x3   :  { %11 = vsyncpa [#allocation4 + $0x1], 0  ;;  %s563_s6 = smov 0   ;;  %s565_s7 = smov 0  }
   0x4   :  { %s567_s8 = smov 0   ;;  %s569_s9 = smov 0  }
   0x5 LB: > { %s584_s10 = sadd.s32 4294967295, %s543_s9   ;;  %s375_s11 = sadd.s32 4294967294, %s543_s9   ;;  %s543_s9 = sphi %s569_s9, %s767_s9   ;;  %s539_s8 = sphi %s567_s8, %s766_s8   ;;  %s535_s7 = sphi %s565_s7, %s765_s7   ;;  %s531_s6 = sphi %s563_s6, %s764_s6  }
   0x6   : > { %s588_s12 = sadd.s32 1, %s543_s9   ;;  %s24_s13 = sadd.s32 1, %s539_s8 }
   0x7   : > { %s21_s14 = ssub.s32 %s543_s9, %s588_s12  ;;  %p31_p0 = scmp.ne.s32.totalorder %s539_s8, %s535_s7 }
   0x8   : > { %p22_p1 = scmp.eq.s32.totalorder %s21_s14, 0  ;;  %p32_p2 = scmp.eq.s32.totalorder %s543_s9, 0 }
   0x9   : > { %p37_p3 = scmp.ne.s32.totalorder %s535_s7, %s531_s6  ;;  %p38_p4 = scmp.eq.s32.totalorder %s584_s10, 0 }
   0xa   : > { %s600_s15 = scalar_select %p22_p1, %s539_s8, %s24_s13  }
   0xb   : > { %p602_p5 = por %p32_p2, %p31_p0  ;;  %p606_p6 = por %p38_p4, %p37_p3 }
   0xc   : > { %p61_p7 = scmp.eq.s32.totalorder %s584_s10, 1  ;;  %p67_p8 = scmp.eq.s32.totalorder %s375_s11, 1 }
   0xd   : > { %p407_p10 = scmp.lt.s32.totalorder %s543_s9, 2  ;;  %s87_s20 = sand.u32 1, %s539_s8  }
   0xe   : > { %p613_p11 = por %p61_p7, %p31_p0  ;;  %p617_p12 = por %p67_p8, %p37_p3 }
   0xf   : > { %s392_s21 = sshll.u32 %s543_s9, 9  ;;  %s378_s22 = sshll.u32 %s87_s20, 5 }
  0x10   : > { %s758_s18 = scalar_select %p613_p11, 1, 0 }
  0x11   : > { %s759_s19 = scalar_select %p617_p12, 1, 0 }
  0x12   : > { %s626_s25 = scalar_lea.hbm %s753_s0, %s392_s21  ;;  %s91_s26 = scalar_lea.vmem [#allocation2], %s378_s22 }
  0x13   : > { %s99_s27 = sshll.u32 %s91_s26, 4  ;;  %p630_p13 = pnand %p407_p10, %p602_p5  ;;  %s634_s27 = int_to_ptr.vmem [resolvable:$true] %s99_s27 }
  0x14   : > { %s636_s29 = scalar_lea.sflag [#allocation3], %s87_s20  ;;  %s447_s30 = scalar_lea.hbm %s626_s25, 512 }
  0x15   : > { %p448_p0 = scmp.ne.s32.totalorder %s626_s25, %s447_s30  ;;  %p449_p1 = pneg %p630_p13 }
  0x16   : > { %s452_s4 = scalar_lea.hbm %s753_s0, 1024  ;;  %p453_p4 = scmp.lt.u32.totalorder %s626_s25, %s753_s0 }
  0x17   : > { %p450_p2 = pnand %p449_p1, %p448_p0  ;;  %p454_p5 = scmp.lt.u32.totalorder %s452_s4, %s447_s30 }
  0x18   : > { %p456_p8 = scmp.lt.u32.totalorder %s447_s30, %s626_s25 }
  0x19   : > { %p451_p3 = pneg %p450_p2  ;;  %p455_p7 = por %p454_p5, %p453_p4 }
  0x1b   : > { %p457_p10 = por %p456_p8, %p455_p7 }
  0x1d   : > { %p458_p9 = pnand %p457_p10, %p451_p3 }
  0x1f   : > { %461 = shalt.err (!%p458_p9)
}
  0x20   : > { %s462_s13 = scalar_lea.vmem %s634_s27, 512  ;;  %s545_s14 = smov [#allocation2]  }
  0x21   : > { %p463_p0 = scmp.ne.s32.totalorder %s634_s27, %s462_s13  ;;  %s467_s16 = sshll.u32 %s545_s14, 4  ;;  %s468_s16 = int_to_ptr.vmem [resolvable:$false] %s467_s16 }
  0x22   : > { %s469_s20 = scalar_lea.vmem %s468_s16, 1024  ;;  %p470_p11 = scmp.lt.s32.totalorder %s634_s27, %s468_s16 }
  0x23   : > { %p465_p2 = pnand %p463_p0, %p449_p1  ;;  %p471_p4 = scmp.lt.s32.totalorder %s469_s20, %s462_s13 }
  0x25   : > { %p466_p12 = pneg %p465_p2  ;;  %p472_p5 = por %p471_p4, %p470_p11 }
  0x27   : > { %p473_p7 = pnand %p472_p5, %p466_p12 }
  0x29   : > { %476 = shalt.err (!%p473_p7)
}
  0x2a   : > { %s546_s21 = smov 128   ;;  %s547_s22 = smov 8  }
  0x2b   : > { %402 = dma.hbm_to_vmem [thread:$0]  (!%p630_p13), %s626_s25, 512, %s634_s27, %s636_s29, %s546_s21, %s546_s21, %s547_s22  }
  0x2c   : > { %p382_p9 = scmp.ge.s32.totalorder %s543_s9, 1  ;;  %p107_p1 = scmp.lt.s32.totalorder %s543_s9, 3 }
  0x2e   : > { %p108_p3 = pnand %p382_p9, %p107_p1 }
  0x2f   : > { %s667_s23 = sand.u32 (!%p108_p3), 1, %s535_s7  }
  0x30   : > { %111 = sbr.rel (%p108_p3) target bundleno = 220 (0xdc), region = 24  ;;  %s383_s24 = sshll.u32 (!%p108_p3), %s667_s23, 5 }
  0x31   : > { %s114_s26 = scalar_lea.sflag (!%p108_p3), [#allocation3], %s667_s23  ;;  %s117_s30 = scalar_lea.vmem (!%p108_p3), [#allocation2], %s383_s24 }
  0x37   : > { %522 = dma.done.wait (%p606_p6), %s114_s26, 512  }
  0x38   : > { %524 = vsyncadd (%p606_p6), %s114_s26, 4294966784  ;;  %v140_v0 = vld [vmem:[%s117_s30 + $0x10] sm:$0xff]  ;;  %v138_v1 = vld [vmem:[%s117_s30] sm:$0xff]  ;;  %s548_s25 = smov 1   ;;  %s549_s27 = smov 127   ;;  %vm158_vm0 = vcmask 7168  }
  0x39   : > { %150 = vrot.lane.b32.xlu1 %v140_v0, %s548_s25  ;;  %146 = vrot.lane.b32.xlu0 %v138_v1, %s548_s25  ;;  %v141_v2 = vld [vmem:[%s117_s30 + $0x18] sm:$0xff]  ;;  %v139_v3 = vld [vmem:[%s117_s30 + $0x8] sm:$0xff]  ;;  %v184_v6 = vmul.f32 2.0, %v138_v1  ;;  %vm175_vm1 = vcmask 121856   ;;  %v186_v12 = vmul.f32 2.0, %v140_v0  ;;  %vm213_vm2 = vcmask 1046528  }
  0x3a   : > { %v185_v8 = vmul.f32 2.0, %v139_v3  ;;  %v187_v13 = vmul.f32 2.0, %v141_v2  ;;  %vm200_vm3 = vcmask 1040384   ;;  %vm282_vm4 = vcmask 130048   ;;  %s135_s17 = scalar_lea.vmem [#allocation5], %s383_s24  ;;  %s394_s28 = sshll.u32 %s584_s10, 9 }
  0x3b   : > { %s302_s29 = sshll.u32 %s135_s17, 4  ;;  %s705_s4 = scalar_lea.hbm %s754_s1, %s394_s28  ;;  %s707_s29 = int_to_ptr.vmem [resolvable:$true] %s302_s29 }
  0x3c   : > { %s288_s10 = scalar_lea.sflag [#allocation4], %s667_s23  ;;  %s477_s5 = scalar_lea.vmem %s707_s29, 512 }
  0x3d   : > { %152 = vrot.lane.b32.xlu1 %v141_v2, %s548_s25  ;;  %148 = vrot.lane.b32.xlu0 %v139_v3, %s548_s25  ;;  %p478_p6 = scmp.ne.s32.totalorder %s707_s29, %s477_s5  ;;  %p761_p11 = scmp.ne.s32.totalorder %s758_s18, 0 }
  0x3e   : > { %s550_s11 = smov [#allocation5]  }
  0x3f   : > { %p479_p12 = pnand %p478_p6, %p761_p11  ;;  %s481_s13 = sshll.u32 %s550_s11, 4  ;;  %s482_s13 = int_to_ptr.vmem [resolvable:$false] %s481_s13 }
  0x40   : > { %s483_s14 = scalar_lea.vmem %s482_s13, 1024  ;;  %p484_p8 = scmp.lt.s32.totalorder %s707_s29, %s482_s13 }
  0x41   : > { %165 = vrot.lane.b32.xlu1 %v139_v3, %s549_s27  ;;  %163 = vrot.lane.b32.xlu0 %v138_v1, %s549_s27  ;;  %p480_p13 = pneg %p479_p12  ;;  %p485_p10 = scmp.lt.s32.totalorder %s483_s14, %s477_s5 }
  0x43   : > { %p486_p0 = por %p485_p10, %p484_p8 }
  0x45   : > { %169 = vrot.lane.b32.xlu1 %v141_v2, %s549_s27  ;;  %167 = vrot.lane.b32.xlu0 %v140_v0, %s549_s27  ;;  %p487_p2 = pnand %p486_p0, %p480_p13 }
  0xab   : > { %v151_v4 = vpop.permute.xlu1 %150  ;;  %v147_v5 = vpop.permute.xlu0 %146 }
  0xac   : > { %v159_v10 = vsel %vm158_vm0, 0.0, %v147_v5  ;;  %v161_v14 = vsel %vm158_vm0, 0.0, %v151_v4 }
  0xad   : > { %v188_v15 = vadd.f32 %v184_v6, %v159_v10  ;;  %v190_v26 = vadd.f32 %v186_v12, %v161_v14 }
  0xaf   : > { %v153_v7 = vpop.permute.xlu1 %152  ;;  %v149_v9 = vpop.permute.xlu0 %148 }
  0xb0   : > { %v160_v11 = vsel %vm158_vm0, 0.0, %v149_v9  ;;  %v162_v16 = vsel %vm158_vm0, 0.0, %v153_v7 }
  0xb1   : > { %v189_v17 = vadd.f32 %v185_v8, %v160_v11  ;;  %v191_v27 = vadd.f32 %v187_v13, %v162_v16 }
  0xb3   : > { %v166_v18 = vpop.permute.xlu1 %165  ;;  %v164_v19 = vpop.permute.xlu0 %163 }
  0xb4   : > { %v177_v20 = vsel %vm175_vm1, %v166_v18, 0.0  ;;  %v176_v21 = vsel %vm175_vm1, %v164_v19, 0.0 }
  0xb5   : > { %v181_v22 = vsub.f32 %v177_v20, %v160_v11  ;;  %v193_v23 = vadd.f32 %v189_v17, %v177_v20  ;;  %v180_v24 = vsub.f32 %v176_v21, %v159_v10  ;;  %v192_v25 = vadd.f32 %v188_v15, %v176_v21 }
  0xb7   : > { %v202_v28 = vrot.slane %v181_v22, 7  ;;  %v215_v29 = vrot.slane %v181_v22, 1  ;;  %v231_v30 = vrot.slane %v193_v23, 7  ;;  %v243_v31 = vrot.slane %v193_v23, 1  ;;  %v170_v40 = vpop.permute.xlu1 %169  ;;  %v168_v41 = vpop.permute.xlu0 %167 }
  0xb8   : > { %v255_v32 = vmul.f32 2.0, %v181_v22  ;;  %v201_v33 = vrot.slane %v180_v24, 7  ;;  %v214_v34 = vrot.slane %v180_v24, 1  ;;  %v230_v35 = vrot.slane %v192_v25, 7 }
  0xb9   : > { %v224_v36 = vsel %vm213_vm2, %v215_v29, 0.0  ;;  %v252_v37 = vsel %vm213_vm2, %v243_v31, 0.0  ;;  %v242_v38 = vrot.slane %v192_v25, 1  ;;  %v254_v39 = vmul.f32 2.0, %v180_v24 }
  0xba   : > { %v203_v42 = vsel %vm200_vm3, %v201_v33, %v202_v28  ;;  %v211_v43 = vsel %vm200_vm3, 0.0, %v201_v33  ;;  %v216_v44 = vsel %vm213_vm2, %v214_v34, %v215_v29  ;;  %v232_v45 = vsel %vm200_vm3, %v230_v35, %v231_v30 }
  0xbb   : > { %v240_v46 = vsel %vm200_vm3, 0.0, %v230_v35  ;;  %v244_v47 = vsel %vm213_vm2, %v242_v38, %v243_v31  ;;  %v258_v48 = vadd.f32 %v254_v39, %v211_v43  ;;  %v259_v49 = vadd.f32 %v255_v32, %v203_v42 }
  0xbc   : > { %v266_v50 = vsub.f32 %v240_v46, %v244_v47  ;;  %v267_v51 = vsub.f32 %v232_v45, %v252_v37  ;;  %v179_v52 = vsel %vm175_vm1, %v170_v40, 0.0  ;;  %v178_v53 = vsel %vm175_vm1, %v168_v41, 0.0 }
  0xbd   : > { %v262_v54 = vadd.f32 %v258_v48, %v216_v44  ;;  %v263_v55 = vadd.f32 %v259_v49, %v224_v36  ;;  %v183_v56 = vsub.f32 %v179_v52, %v162_v16  ;;  %v195_v57 = vadd.f32 %v191_v27, %v179_v52 }
  0xbe   : > { %v274_v58 = vand.u32 2147483647, %v266_v50  ;;  %v275_v59 = vand.u32 2147483647, %v267_v51  ;;  %v182_v60 = vsub.f32 %v178_v53, %v161_v14  ;;  %v194_v61 = vadd.f32 %v190_v26, %v178_v53 }
  0xbf   : > { %v270_v62 = vand.u32 2147483647, %v262_v54  ;;  %v271_v63 = vand.u32 2147483647, %v263_v55  ;;  %v205_v0 = vrot.slane %v183_v56, 7  ;;  %v218_v1 = vrot.slane %v183_v56, 1 }
  0xc0   : > { %v234_v2 = vrot.slane %v195_v57, 7  ;;  %v246_v3 = vrot.slane %v195_v57, 1  ;;  %v257_v4 = vmul.f32 2.0, %v183_v56  ;;  %v204_v5 = vrot.slane %v182_v60, 7 }
  0xc1   : > { %v278_v6 = vadd.f32 %v274_v58, %v270_v62  ;;  %v279_v7 = vadd.f32 %v275_v59, %v271_v63  ;;  %v217_v8 = vrot.slane %v182_v60, 1  ;;  %v233_v12 = vrot.slane %v194_v61, 7 }
  0xc2   : > { %v253_v9 = vsel %vm213_vm2, %v246_v3, 0.0  ;;  %v206_v10 = vsel %vm200_vm3, %v204_v5, %v205_v0  ;;  %v212_v11 = vsel %vm200_vm3, 0.0, %v204_v5  ;;  %v245_v13 = vrot.slane %v194_v61, 1 }
  0xc3   : > { %283 = vst.msk [vmem:[%s135_s17] sm:$0xff] %vm282_vm4, %v278_v6  ;;  %284 = vst.msk [vmem:[%s135_s17 + $0x8] sm:$0xff] %vm282_vm4, %v279_v7  ;;  %v256_v14 = vmul.f32 2.0, %v182_v60  ;;  %v261_v15 = vadd.f32 %v257_v4, %v206_v10  ;;  %v225_v16 = vsel %vm213_vm2, %v218_v1, 0.0  ;;  %v235_v17 = vsel %vm200_vm3, %v233_v12, %v234_v2 }
  0xc4   : > { %v241_v18 = vsel %vm200_vm3, 0.0, %v233_v12  ;;  %v247_v19 = vsel %vm213_vm2, %v245_v13, %v246_v3  ;;  %v269_v22 = vsub.f32 %v235_v17, %v253_v9  ;;  %v219_v23 = vsel %vm213_vm2, %v217_v8, %v218_v1 }
  0xc5   : > { %v260_v20 = vadd.f32 %v256_v14, %v212_v11  ;;  %v265_v21 = vadd.f32 %v261_v15, %v225_v16  ;;  %v268_v24 = vsub.f32 %v241_v18, %v247_v19 }
  0xc6   : > { %v277_v27 = vand.u32 2147483647, %v269_v22 }
  0xc7   : > { %v264_v25 = vadd.f32 %v260_v20, %v219_v23  ;;  %v273_v26 = vand.u32 2147483647, %v265_v21  ;;  %v276_v29 = vand.u32 2147483647, %v268_v24 }
  0xc9   : > { %v272_v28 = vand.u32 2147483647, %v264_v25  ;;  %v281_v30 = vadd.f32 %v277_v27, %v273_v26 }
  0xcb   : > { %v280_v31 = vadd.f32 %v276_v29, %v272_v28  ;;  %286 = vst.msk [vmem:[%s135_s17 + $0x18] sm:$0xff] %vm282_vm4, %v281_v30 }
  0xcd   : > { %285 = vst.msk [vmem:[%s135_s17 + $0x10] sm:$0xff] %vm282_vm4, %v280_v31 }
  0xce   : > { %490 = shalt.err (!%p487_p2)
}
  0xcf   : > { %s491_s16 = scalar_lea.hbm %s705_s4, 512  ;;  %s495_s22 = scalar_lea.hbm %s754_s1, 1024 }
  0xd0   : > { %p492_p4 = scmp.ne.s32.totalorder %s705_s4, %s491_s16  ;;  %p496_p9 = scmp.lt.u32.totalorder %s705_s4, %s754_s1 }
  0xd1   : > { %p497_p1 = scmp.lt.u32.totalorder %s495_s22, %s491_s16  ;;  %p499_p6 = scmp.lt.u32.totalorder %s491_s16, %s705_s4 }
  0xd2   : > { %p493_p5 = pnand %p492_p4, %p761_p11 }
  0xd3   : > { %p498_p3 = por %p497_p1, %p496_p9 }
  0xd4   : > { %p494_p7 = pneg %p493_p5 }
  0xd5   : > { %p500_p12 = por %p499_p6, %p498_p3 }
  0xd7   : > { %p501_p13 = pnand %p500_p12, %p494_p7 }
  0xd9   : > { %504 = shalt.err (!%p501_p13)
}
  0xda   : > { %s551_s30 = smov 128   ;;  %s552_s25 = smov 8  }
  0xdb   : > { %397 = dma.vmem_to_hbm [thread:$0]  (%p761_p11), %s707_s29, 512, %s705_s4, %s288_s10, %s551_s30, %s551_s30, %s552_s25  }
  0xdc PF: > { %s317_s27 = sand.u32 1, %s531_s6   ;;  %p762_p8 = scmp.ne.s32.totalorder %s759_s19, 0 }
  0xdd   : > { %p763_p10 = scmp.ge.s32.totalorder %s543_s9, 2  ;;  %s318_s17 = scalar_lea.sflag [#allocation4], %s317_s27 }
  0xdf   : > { %p404_p0 = pnand %p763_p10, %p762_p8 }
  0xe1   : > { %526 = dma.done.wait (!%p404_p0), %s318_s17, 512  }
  0xe2   : > { %528 = vsyncadd (!%p404_p0), %s318_s17, 4294966784  ;;  %p14_p2 = scmp.ge.s32.totalorder %s588_s12, 4   ;;  %s764_s6 = smov %s535_s7 }
  0xe3   : > { %s765_s7 = smov %s539_s8  ;;  %s766_s8 = smov %s600_s15 }
  0xe4   : > { %s767_s9 = smov %s588_s12  ;;  %16 = sbr.rel (!%p14_p2) target bundleno = 5 (0x5), region = 69 }
  0xeb   :  { %323 = vsyncpa [#allocation3], 1 }
  0xec   :  { %325 = vsyncpa [#allocation3 + $0x1], 1 }
  0xed   :  { %326 = vsyncpa [#allocation4], 1 }
  0xee   :  { %328 = vsyncpa [#allocation4 + $0x1], 1 }

</bundles_post_ra>
